<compile_context>
chip_gen: v6e
topology: v6e:2x2x1
jax: 0.10.0
libtpu: 0.0.40
codegen_flags: <defaults>
</compile_context>

<pallas_src>
import functools

import jax
import jax.numpy as jnp
from jax import lax
from jax.experimental import pallas as pl
from jax.experimental.pallas import tpu as pltpu


def _round_up(x, m):
    return ((x + m - 1) // m) * m


def fc_relu_kernel(x_ref, w_ref, b_ref, o_ref, acc_ref):
    # x_ref: (tm, tk)   w_ref: (tn, tk)   b_ref: (1, tn)
    # o_ref: (tm, tn)   acc_ref: (tm, tn) f32 scratch, resident across K
    k = pl.program_id(2)

    @pl.when(k == 0)
    def _():
        acc_ref[...] = jnp.zeros_like(acc_ref)

    # Contract x's feature dim with w's feature dim (w kept in (outc, inc) layout).
    acc_ref[...] += lax.dot_general(
        x_ref[...], w_ref[...],
        dimension_numbers=(((1,), (1,)), ((), ())),
        preferred_element_type=jnp.float32,
    )

    @pl.when(k == pl.num_programs(2) - 1)
    def _():
        y = acc_ref[...] + b_ref[...]          # bias broadcast over batch rows
        o_ref[...] = jnp.maximum(y, 0.0).astype(o_ref.dtype)


@functools.partial(jax.jit, static_argnames=("tm", "tn", "tk"))
def fc_forward(x, weight, bias, *, tm=256, tn=256, tk=512):
    """FC forward: ReLU(x @ weight.T + bias).

    x:      (B, inc)    float32
    weight: (outc, inc) PyTorch nn.Linear layout (NOT transposed by the wrapper)
    bias:   (outc,)
    """
    B, inc = x.shape
    outc = weight.shape[0]

    # Shrink tiles for small problems, keeping (sublane, lane) alignment:
    # tm multiple of 8, tn/tk multiples of 128 (256 preferred on v6e/v7x).
    tm = min(tm, _round_up(B, 8))
    tn = min(tn, _round_up(outc, 128))
    tk = min(tk, _round_up(inc, 128))

    Bp = _round_up(B, tm)
    Np = _round_up(outc, tn)
    Kp = _round_up(inc, tk)

    # Zero-padding: padded K columns contribute 0 to the dot; padded N columns
    # are sliced off below; padded M rows are sliced off below.
    if (Bp, Kp) != (B, inc):
        x = jnp.pad(x, ((0, Bp - B), (0, Kp - inc)))
    if (Np, Kp) != (outc, inc):
        weight = jnp.pad(weight, ((0, Np - outc), (0, Kp - inc)))
    b2d = bias.reshape(1, outc)
    if Np != outc:
        b2d = jnp.pad(b2d, ((0, 0), (0, Np - outc)))

    grid = (Bp // tm, Np // tn, Kp // tk)

    out = pl.pallas_call(
        fc_relu_kernel,
        out_shape=jax.ShapeDtypeStruct((Bp, Np), x.dtype),
        grid_spec=pltpu.PrefetchScalarGridSpec(
            num_scalar_prefetch=0,
            grid=grid,
            in_specs=[
                pl.BlockSpec((tm, tk), lambda i, j, k: (i, k)),   # x
                pl.BlockSpec((tn, tk), lambda i, j, k: (j, k)),   # weight (outc, inc)
                pl.BlockSpec((1, tn), lambda i, j, k: (0, j)),    # bias
            ],
            out_specs=pl.BlockSpec((tm, tn), lambda i, j, k: (i, j)),
            scratch_shapes=[pltpu.VMEM((tm, tn), jnp.float32)],
        ),
        compiler_params=pltpu.CompilerParams(
            dimension_semantics=("parallel", "parallel", "arbitrary"),
            vmem_limit_bytes=48 << 20,   # safe on v5e/v6e (128 MiB) and v7x (64 MiB)
        ),
    )(x, weight, b2d)

    return out[:B, :outc]


def fc_reference(x, weight, bias):
    return jnp.maximum(x @ weight.T + bias, 0.0)


if __name__ == "__main__":
    key = jax.random.PRNGKey(0)
    k_x, k_w, k_b = jax.random.split(key, 3)

    B, inc, outc = 8, 32, 64

    # Deterministic init mimicking nn.Linear's uniform(-1/sqrt(inc), 1/sqrt(inc)).
    bound = 1.0 / jnp.sqrt(inc)
    weight = jax.random.uniform(k_w, (outc, inc), jnp.float32, -bound, bound)
    bias = jax.random.uniform(k_b, (outc,), jnp.float32, -bound, bound)
    x = jax.random.normal(k_x, (B, inc), jnp.float32)

    # TODO(synk): BatchNorm1d branch (batch_norm=True) not implemented; default config has bn=None.

    out = fc_forward(x, weight, bias)
    out = jax.block_until_ready(out)

    ref = fc_reference(x, weight, bias)
    assert out.shape == (B, outc)
    assert jnp.allclose(out, ref, atol=1e-5, rtol=1e-5)

    print("KERNEL_OK")
</pallas_src>

<mosaic_0001>
module attributes {stable_mosaic.version = 11 : i64} {
  func.func @fc_relu_kernel(%arg0: i32, %arg1: i32, %arg2: i32, %arg3: memref<8x128xf32, #tpu.memory_space<vmem>>, %arg4: memref<128x128xf32, #tpu.memory_space<vmem>>, %arg5: memref<1x128xf32, #tpu.memory_space<vmem>>, %arg6: memref<8x128xf32, #tpu.memory_space<vmem>>, %arg7: memref<8x128xf32, #tpu.memory_space<vmem>>) attributes {dimension_semantics = [#tpu.dimension_semantics<parallel>, #tpu.dimension_semantics<parallel>, #tpu.dimension_semantics<arbitrary>], iteration_bounds = array<i64: 1, 1, 1>, scalar_prefetch = 0 : i64, scratch_operands = 1 : i64, tpu.core_type = #tpu.core_type<tc>, window_params = [{transform_indices = @transform_0, window_bounds = array<i64: 8, 128>}, {transform_indices = @transform_1, window_bounds = array<i64: 128, 128>}, {transform_indices = @transform_2, window_bounds = array<i64: 1, 128>}, {transform_indices = @transform_3, window_bounds = array<i64: 8, 128>}]} {
    %c0_i32 = arith.constant 0 : i32
    %0 = arith.cmpi eq, %arg2, %c0_i32 : i32
    %1 = arith.extui %0 : i1 to i32
    %c0_i32_0 = arith.constant 0 : i32
    %2 = arith.cmpi ne, %1, %c0_i32_0 : i32
    scf.if %2 {
      %cst_10 = arith.constant 0.000000e+00 : f32
      %12 = vector.broadcast %cst_10 : f32 to vector<8x128xf32>
      %c0_11 = arith.constant 0 : index
      %c0_12 = arith.constant 0 : index
      %13 = vector.load %arg7[%c0_11, %c0_12] : memref<8x128xf32, #tpu.memory_space<vmem>>, vector<8x128xf32>
      tpu.vector_store %arg7[%c0_11, %c0_12], %12 {strides = array<i32>} : memref<8x128xf32, #tpu.memory_space<vmem>>, vector<8x128xf32>,
    } else {
    }
    %c0 = arith.constant 0 : index
    %c0_1 = arith.constant 0 : index
    %3 = vector.load %arg7[%c0, %c0_1] : memref<8x128xf32, #tpu.memory_space<vmem>>, vector<8x128xf32>
    %c0_2 = arith.constant 0 : index
    %c0_3 = arith.constant 0 : index
    %4 = vector.load %arg3[%c0_2, %c0_3] : memref<8x128xf32, #tpu.memory_space<vmem>>, vector<8x128xf32>
    %c0_4 = arith.constant 0 : index
    %c0_5 = arith.constant 0 : index
    %5 = vector.load %arg4[%c0_4, %c0_5] : memref<128x128xf32, #tpu.memory_space<vmem>>, vector<128x128xf32>
    %cst = arith.constant dense<0.000000e+00> : vector<8x128xf32>
    %6 = tpu.matmul %4, %5, %cst {dimension_numbers = #tpu.dot_dimension_numbers<[1], [1], [0], [0], [0, 0, 1, 0], [], []>} : vector<8x128xf32>, vector<128x128xf32>, vector<8x128xf32> -> vector<8x128xf32>
    %7 = arith.addf %3, %6 : vector<8x128xf32>
    %c0_6 = arith.constant 0 : index
    %c0_7 = arith.constant 0 : index
    %8 = vector.load %arg7[%c0_6, %c0_7] : memref<8x128xf32, #tpu.memory_space<vmem>>, vector<8x128xf32>
    tpu.vector_store %arg7[%c0_6, %c0_7], %7 {strides = array<i32>} : memref<8x128xf32, #tpu.memory_space<vmem>>, vector<8x128xf32>,
    %c0_i32_8 = arith.constant 0 : i32
    %9 = arith.cmpi eq, %arg2, %c0_i32_8 : i32
    %10 = arith.extui %9 : i1 to i32
    %c0_i32_9 = arith.constant 0 : i32
    %11 = arith.cmpi ne, %10, %c0_i32_9 : i32
    scf.if %11 {
      %c0_10 = arith.constant 0 : index
      %c0_11 = arith.constant 0 : index
      %12 = vector.load %arg7[%c0_10, %c0_11] : memref<8x128xf32, #tpu.memory_space<vmem>>, vector<8x128xf32>
      %c0_12 = arith.constant 0 : index
      %c0_13 = arith.constant 0 : index
      %13 = vector.load %arg5[%c0_12, %c0_13] : memref<1x128xf32, #tpu.memory_space<vmem>>, vector<1x128xf32>
      %14 = vector.broadcast %13 : vector<1x128xf32> to vector<8x128xf32>
      %15 = arith.addf %12, %14 : vector<8x128xf32>
      %cst_14 = arith.constant 0.000000e+00 : f32
      %16 = vector.broadcast %cst_14 : f32 to vector<8x128xf32>
      %17 = arith.maximumf %15, %16 : vector<8x128xf32>
      %c0_15 = arith.constant 0 : index
      %c0_16 = arith.constant 0 : index
      %18 = vector.load %arg6[%c0_15, %c0_16] : memref<8x128xf32, #tpu.memory_space<vmem>>, vector<8x128xf32>
      tpu.vector_store %arg6[%c0_15, %c0_16], %17 {strides = array<i32>} : memref<8x128xf32, #tpu.memory_space<vmem>>, vector<8x128xf32>,
    } else {
    }
    return
  }
  func.func @transform_0(%arg0: i32, %arg1: i32, %arg2: i32) -> (i32, i32) {
    %c0_i32 = arith.constant 0 : i32
    return %arg0, %arg2 : i32, i32
  }
  func.func @transform_1(%arg0: i32, %arg1: i32, %arg2: i32) -> (i32, i32) {
    %c0_i32 = arith.constant 0 : i32
    return %arg1, %arg2 : i32, i32
  }
  func.func @transform_2(%arg0: i32, %arg1: i32, %arg2: i32) -> (i32, i32) {
    %c0_i32 = arith.constant 0 : i32
    %c0_i32_0 = arith.constant 0 : i32
    return %c0_i32, %arg1 : i32, i32
  }
  func.func @transform_3(%arg0: i32, %arg1: i32, %arg2: i32) -> (i32, i32) {
    %c0_i32 = arith.constant 0 : i32
    return %arg0, %arg1 : i32, i32
  }
}

</mosaic_0001>

<bundles_post_ra>
// kernel: fc_forward.1
= control target key start
LH: loop header
LB: loop body
LE: loop exit
PB: predicated region body
PF: predicated region fallthrough
CT: control target
= control target key end

     0   :  { %v216_v1 = vmov 0.0   ;;  %vm217_vm0 = vmmov 0   ;;  %s296_s0 = inlined_call_operand.vmem [shape: f32[8,128], index: 0, kind: input, shape index: {}]   ;;  %s297_s1 = inlined_call_operand.vmem [shape: f32[128,128], index: 1, kind: input, shape index: {}]   ;;  %s298_s2 = inlined_call_operand.vmem [shape: f32[1,128], index: 2, kind: input, shape index: {}]   ;;  %s299_s3 = inlined_call_operand.hbm [shape: f32[8,128], index: 3, kind: output, shape index: {}]  }
   0x1   :  { %v37_v0 = vld [vmem:[%s297_s1 + $0x78] sm:$0xff]  ;;  %156 = vmatprep.subr.mxu0 %v216_v1  ;;  %188 = vmatprep.mubr.msk.f32.mxu0 %vm217_vm0, %v216_v1  ;;  %v36_v2 = vld [vmem:[%s297_s1 + $0x70] sm:$0xff] }
   0x2   :  { %157 = vmatpush3.xpose.msra.mxu0 %v37_v0 }
   0x3   :  { %158 = vmatprep.subr.mxu0 %v216_v1 }
   0x4   :  { %8 = vsyncpa [#allocation4], 0  ;;  %v35_v3 = vld [vmem:[%s297_s1 + $0x68] sm:$0xff]  ;;  %v34_v4 = vld [vmem:[%s297_s1 + $0x60] sm:$0xff]  ;;  %s218_s21 = smov [#allocation3]  }
   0x5   :  { %v33_v5 = vld [vmem:[%s297_s1 + $0x58] sm:$0xff]  ;;  %v32_v6 = vld [vmem:[%s297_s1 + $0x50] sm:$0xff]  ;;  %v31_v7 = vld [vmem:[%s297_s1 + $0x48] sm:$0xff]  ;;  %s130_s22 = sshll.u32 %s218_s21, 4  ;;  %s131_s22 = int_to_ptr.vmem [resolvable:$true] %s130_s22 }
   0x6   :  { %159 = vmatpush3.xpose.msra.mxu0 %v36_v2  ;;  %v30_v8 = vld [vmem:[%s297_s1 + $0x40] sm:$0xff]  ;;  %v29_v9 = vld [vmem:[%s297_s1 + $0x38] sm:$0xff]  ;;  %v28_v10 = vld [vmem:[%s297_s1 + $0x30] sm:$0xff]  ;;  %s194_s23 = scalar_lea.vmem %s131_s22, 128  ;;  %p199_p1 = scmp.lt.s32.totalorder %s131_s22, %s131_s22 }
   0x7   :  { %160 = vmatprep.subr.mxu0 %v216_v1  ;;  %v27_v11 = vld [vmem:[%s297_s1 + $0x28] sm:$0xff]  ;;  %v26_v12 = vld [vmem:[%s297_s1 + $0x20] sm:$0xff]  ;;  %v25_v13 = vld [vmem:[%s297_s1 + $0x18] sm:$0xff]  ;;  %p195_p0 = scmp.ne.s32.totalorder %s131_s22, %s194_s23  ;;  %p200_p2 = scmp.lt.s32.totalorder %s194_s23, %s194_s23 }
   0x8   :  { %v24_v14 = vld [vmem:[%s297_s1 + $0x10] sm:$0xff]  ;;  %v23_v15 = vld [vmem:[%s297_s1 + $0x8] sm:$0xff]  ;;  %v22_v16 = vld [vmem:[%s297_s1] sm:$0xff] }
   0x9   :  { %v21_v17 = vld [vmem:[%s296_s0] sm:$0xff]  ;;  %p201_p3 = por %p200_p2, %p199_p1 }
   0xa   :  { %161 = vmatpush3.xpose.msra.mxu0 %v35_v3  ;;  %v138_v18 = vld [vmem:[%s298_s2] ss:$0 sm:$0xff] }
   0xb   :  { %162 = vmatprep.subr.mxu0 %v216_v1  ;;  %p202_p4 = pnand %p201_p3, %p195_p0 }
   0xe   :  { %163 = vmatpush3.xpose.msra.mxu0 %v34_v4 }
   0xf   :  { %164 = vmatprep.subr.mxu0 %v216_v1 }
  0x12   :  { %165 = vmatpush3.xpose.msra.mxu0 %v33_v5 }
  0x13   :  { %166 = vmatprep.subr.mxu0 %v216_v1 }
  0x16   :  { %167 = vmatpush3.xpose.msra.mxu0 %v32_v6 }
  0x17   :  { %168 = vmatprep.subr.mxu0 %v216_v1 }
  0x1a   :  { %169 = vmatpush3.xpose.msra.mxu0 %v31_v7 }
  0x1b   :  { %170 = vmatprep.subr.mxu0 %v216_v1 }
  0x1e   :  { %171 = vmatpush3.xpose.msra.mxu0 %v30_v8 }
  0x1f   :  { %172 = vmatprep.subr.mxu0 %v216_v1 }
  0x22   :  { %173 = vmatpush3.xpose.msra.mxu0 %v29_v9 }
  0x23   :  { %174 = vmatprep.subr.mxu0 %v216_v1 }
  0x26   :  { %175 = vmatpush3.xpose.msra.mxu0 %v28_v10 }
  0x27   :  { %176 = vmatprep.subr.mxu0 %v216_v1 }
  0x2a   :  { %177 = vmatpush3.xpose.msra.mxu0 %v27_v11 }
  0x2b   :  { %178 = vmatprep.subr.mxu0 %v216_v1 }
  0x2e   :  { %179 = vmatpush3.xpose.msra.mxu0 %v26_v12 }
  0x2f   :  { %180 = vmatprep.subr.mxu0 %v216_v1 }
  0x32   :  { %181 = vmatpush3.xpose.msra.mxu0 %v25_v13 }
  0x33   :  { %182 = vmatprep.subr.mxu0 %v216_v1 }
  0x36   :  { %183 = vmatpush3.xpose.msra.mxu0 %v24_v14 }
  0x37   :  { %184 = vmatprep.subr.mxu0 %v216_v1 }
  0x3a   :  { %185 = vmatpush3.xpose.msra.mxu0 %v23_v15 }
  0x3b   :  { %186 = vmatprep.subr.mxu0 %v216_v1 }
  0x3e   :  { %187 = vmatpush3.xpose.msra.mxu0 %v22_v16 }
  0x41   :  { %189 = vmatmul.mubr.f32.vlgmr.msra.gmra.mxu0 %v21_v17 }
 0x101   :  { %v104_v19 = vpop.f32.mrf.mxu0 }
 0x102   :  { %v121_v20 = vadd.f32 %v138_v18, %v104_v19 }
 0x103   :  { %v190_v21 = vpop.f32.mrf.mxu0 }
 0x104   :  { %v122_v22 = vmax.f32 %v121_v20, 0.0 }
 0x106   :  { %123 = vst [vmem:[#allocation3] sm:$0xff] %v122_v22 }
 0x107   :  { %205 = shalt.err (!%p202_p4)
}
 0x108   :  { %133 = dma.vmem_to_hbm [thread:$0]  %s131_s22, 128, %s299_s3, [#allocation4]  }
 0x109   :  { %214 = dma.done.wait [#allocation4], 128  }
 0x10a   :  { %215 = vsyncadd [#allocation4], 4294967168 }
 0x10b   :  { %137 = vsyncpa [#allocation4], 1 }

</bundles_post_ra>
